<compile_context>
chip_gen: v7x
topology: tpu7x:2x2x1
jax: 0.10.0
libtpu: 0.0.40
codegen_flags: <defaults>
</compile_context>

<pallas_src>
import math
import functools

import jax
import jax.numpy as jnp
from jax import lax
from jax.experimental import pallas as pl
from jax.experimental.pallas import tpu as pltpu


# --------------------------------------------------------------------------- #
# Kernel                                                                      #
# --------------------------------------------------------------------------- #
def _sdpa_kernel(*refs, use_mask, scale, kv_tile, bf16_matmul):
    """One grid step == (batch b, query tile qi, kv tile kvi).

    refs (masked):   valid_lens (SMEM), q, k, v, o, m_sc, l_sc, acc_sc
    refs (unmasked): q, k, v, o, m_sc, l_sc, acc_sc

    q_ref : VMEM (1, TQ, d_k)      k_ref : VMEM (1, TK, d_k)
    v_ref : VMEM (1, TK, d_v)      o_ref : VMEM (1, TQ, d_v)
    m_sc/l_sc : VMEM (TQ, 1) f32   acc_sc : VMEM (TQ, d_v) f32
    """
    if use_mask:
        vlen_ref, q_ref, k_ref, v_ref, o_ref, m_sc, l_sc, acc_sc = refs
    else:
        q_ref, k_ref, v_ref, o_ref, m_sc, l_sc, acc_sc = refs

    kvi = pl.program_id(2)
    n_kv = pl.num_programs(2)

    # Init online-softmax state at the first KV tile of every (b, qi) group.
    @pl.when(kvi == 0)
    def _init():
        m_sc[...] = jnp.full(m_sc.shape, -jnp.inf, dtype=m_sc.dtype)
        l_sc[...] = jnp.zeros(l_sc.shape, dtype=l_sc.dtype)
        acc_sc[...] = jnp.zeros(acc_sc.shape, dtype=acc_sc.dtype)

    if use_mask:
        b = pl.program_id(0)
        vlen = vlen_ref[b]
        start = kvi * kv_tile
        # Skip KV tiles entirely past valid_len (their softmax weight is exactly
        # 0 after max-subtraction).  vlen <= 0 keeps every tile so the reference
        # "uniform attention over all keys" behaviour is preserved.
        live = jnp.logical_or(start < vlen, vlen <= 0)

    # bf16 operands + f32 accumulation when requested (wrapper only enables it
    # for f32 inputs); otherwise keep the native dtype on the MXU.
    mm_dtype = jnp.bfloat16 if bf16_matmul else q_ref.dtype

    def _tile():
        # Fold 1/sqrt(d_k) into Q (TQ*d_k mults instead of TQ*TK).
        q = (q_ref[0] * jnp.asarray(scale, dtype=q_ref.dtype)).astype(mm_dtype)
        k = k_ref[0].astype(mm_dtype)
        # scores = Q K^T : contract last axes directly (no XLU transpose).
        s = lax.dot_general(q, k, dimension_numbers=(((1,), (1,)), ((), ())),
                            preferred_element_type=jnp.float32)   # (TQ, TK) f32
        if use_mask:
            # (1, TK) iota, broadcast against (TQ, TK) scores.
            col = start + lax.broadcasted_iota(jnp.int32, (1, s.shape[-1]), 1)
            s = jnp.where(col < vlen, s, jnp.float32(-1000000.0))

        m_prev = m_sc[...]                                         # (TQ, 1)
        m_new = jnp.maximum(m_prev, jnp.max(s, axis=-1, keepdims=True))
        alpha = jnp.exp(m_prev - m_new)
        p = jnp.exp(s - m_new)                                     # (TQ, TK) f32
        l_sc[...] = alpha * l_sc[...] + jnp.sum(p, axis=-1, keepdims=True)
        pv = lax.dot_general(p.astype(mm_dtype), v_ref[0].astype(mm_dtype),
                             dimension_numbers=(((1,), (0,)), ((), ())),
                             preferred_element_type=jnp.float32)   # (TQ, d_v)
        acc_sc[...] = alpha * acc_sc[...] + pv
        m_sc[...] = m_new

    if use_mask:
        @pl.when(live)
        def _():
            _tile()
    else:
        _tile()

    # Finalize: normalize and write the output tile.
    @pl.when(kvi == n_kv - 1)
    def _finalize():
        # TODO(synk): dropout(attention_weights) skipped (eval mode).
        inv_l = pl.reciprocal(l_sc[...], approx=True)
        o_ref[0] = (acc_sc[...] * inv_l).astype(o_ref.dtype)


# --------------------------------------------------------------------------- #
# Generation-aware tiling / VMEM policy                                       #
# --------------------------------------------------------------------------- #
def _vmem_budget_and_tq_pref():
    """VMEM budget (~78% of physical) and preferred query tile for this chip."""
    try:
        capacity = int(pltpu.get_tpu_info().vmem_capacity_bytes)
    except Exception:                       # info unavailable -> v7x-safe default
        capacity = 64 << 20
    budget = max(32 << 20, int(capacity * 0.78))   # ~50 MiB v7x, ~100 MiB v5e/v6e
    tq_pref = 256                                   # feed the 256-wide MXU (v6e/v7x)
    try:
        kind = jax.devices()[0].device_kind.lower()
        if "v5 lite" in kind or "v5e" in kind or "v5lite" in kind:
            tq_pref = 128                           # 128-wide MXU; halves score temps
    except Exception:
        pass
    return budget, tq_pref


def _select_tiles(seq, d_k, d_v, itemsize, budget, tq_pref):
    """Pick (TQ, TK) so the per-step VMEM footprint fits the budget.

    Prefers TK == seq (K/V DMA'd once per batch element and kept resident),
    then shrinks TQ (down to 128), then shrinks TK (flash-style KV tiling),
    and only then lets TQ drop below 128.
    """
    def fits(tq, tk):
        blocks = 2 * itemsize * (tq * (d_k + d_v) + tk * (d_k + d_v))  # dbl-buffered I/O
        scratch = 4 * tq * (d_v + 2)                                   # acc, m, l (f32)
        temps = 4 * 4 * tq * tk                                        # ~4 f32 (TQ,TK) temps
        return blocks + scratch + temps + (2 << 20) <= budget

    cands = sorted({seq} | {c for c in (512, 256, 128, 64, 32, 16, 8)
                            if c < seq and seq % c == 0}, reverse=True)
    tq_cands = [c for c in cands if c <= tq_pref] or [cands[-1]]
    tq_floor = min(128, tq_cands[0])
    for allow_small_tq in (False, True):
        for tk in cands:
            for tq in tq_cands:
                if not allow_small_tq and tq < tq_floor:
                    continue
                if fits(tq, tk):
                    return tq, tk
    return tq_cands[-1], cands[-1]


# --------------------------------------------------------------------------- #
# Wrapper                                                                     #
# --------------------------------------------------------------------------- #
def scaled_dot_product_attention(queries, keys, values, valid_lens=None, *,
                                 use_bf16_matmul=True, q_tile=None, kv_tile=None):
    """Pallas-backed forward pass of ScaledDotProductAttention (eval mode).

    use_bf16_matmul: when inputs are float32, run both MXU matmuls with bf16
    operands and f32 accumulation (~3x MXU throughput; ~1e-3-level relative
    error on the output).  Set False for full-f32 MXU parity.
    """
    bs, seq, d_k = queries.shape
    d_v = values.shape[-1]
    if keys.shape != (bs, seq, d_k) or values.shape[:2] != (bs, seq):
        raise ValueError("queries/keys/values shape mismatch")
    use_mask = valid_lens is not None
    if use_mask and valid_lens.ndim != 1:
        # TODO(synk): 2-D valid_lens (per-query lengths) is not implemented.
        raise NotImplementedError("only 1-D valid_lens (bs,) is supported")

    budget, tq_pref = _vmem_budget_and_tq_pref()
    itemsize = jnp.dtype(queries.dtype).itemsize
    tq_auto, tk_auto = _select_tiles(seq, d_k, d_v, itemsize, budget, tq_pref)
    tq = int(q_tile) if q_tile is not None else tq_auto
    tk = int(kv_tile) if kv_tile is not None else tk_auto
    if seq % tq != 0 or seq % tk != 0:
        raise ValueError("q_tile / kv_tile must divide seq")
    n_q, n_kv = seq // tq, seq // tk
    scale = 1.0 / math.sqrt(d_k)
    bf16_mm = bool(use_bf16_matmul) and queries.dtype == jnp.float32

    kernel = functools.partial(_sdpa_kernel, use_mask=use_mask, scale=scale,
                               kv_tile=tk, bf16_matmul=bf16_mm)

    scratch_shapes = [
        pltpu.VMEM((tq, 1), jnp.float32),     # running max m
        pltpu.VMEM((tq, 1), jnp.float32),     # running denom l
        pltpu.VMEM((tq, d_v), jnp.float32),   # output accumulator
    ]
    grid = (bs, n_q, n_kv)

    if use_mask:
        valid_lens = valid_lens.astype(jnp.int32)
        grid_spec = pltpu.PrefetchScalarGridSpec(
            num_scalar_prefetch=1,
            grid=grid,
            in_specs=[
                pl.BlockSpec((1, tq, d_k), lambda b, qi, ki, vl: (b, qi, 0)),
                pl.BlockSpec((1, tk, d_k), lambda b, qi, ki, vl: (b, ki, 0)),
                pl.BlockSpec((1, tk, d_v), lambda b, qi, ki, vl: (b, ki, 0)),
            ],
            out_specs=pl.BlockSpec((1, tq, d_v), lambda b, qi, ki, vl: (b, qi, 0)),
            scratch_shapes=scratch_shapes,
        )
        args = (valid_lens, queries, keys, values)
    else:
        grid_spec = pltpu.PrefetchScalarGridSpec(
            num_scalar_prefetch=0,
            grid=grid,
            in_specs=[
                pl.BlockSpec((1, tq, d_k), lambda b, qi, ki: (b, qi, 0)),
                pl.BlockSpec((1, tk, d_k), lambda b, qi, ki: (b, ki, 0)),
                pl.BlockSpec((1, tk, d_v), lambda b, qi, ki: (b, ki, 0)),
            ],
            out_specs=pl.BlockSpec((1, tq, d_v), lambda b, qi, ki: (b, qi, 0)),
            scratch_shapes=scratch_shapes,
        )
        args = (queries, keys, values)

    return pl.pallas_call(
        kernel,
        out_shape=jax.ShapeDtypeStruct((bs, seq, d_v), queries.dtype),
        grid_spec=grid_spec,
        compiler_params=pltpu.CompilerParams(
            # Batch axis parallel (v7x megacore shards whole batch elements, so
            # K/V are fetched once per core); q/kv axes iterate underneath.
            dimension_semantics=("parallel", "arbitrary", "arbitrary"),
            vmem_limit_bytes=int(budget)),
    )(*args)


# --------------------------------------------------------------------------- #
# Pure-JAX reference mirroring the PyTorch module                             #
# --------------------------------------------------------------------------- #
def _reference(queries, keys, values, valid_lens):
    d_k = keys.shape[-1]
    scores = jnp.einsum("bqd,bkd->bqk", queries, keys) / math.sqrt(d_k)
    if valid_lens is not None:
        col = jnp.arange(scores.shape[-1])[None, None, :]
        mask = col < valid_lens[:, None, None]
        scores = jnp.where(mask, scores, -1000000.0)
    w = jax.nn.softmax(scores, axis=-1)
    return jnp.einsum("bqk,bkv->bqv", w, values)


if __name__ == "__main__":
    root = jax.random.PRNGKey(0)
    key1, key2 = jax.random.split(root)

    # ---- Case 1: module's nominal small shapes (bs=2, seq=8, d=32) ----------
    bs, seq, d_k, d_v = 2, 8, 32, 32
    kq, kk, kv = jax.random.split(key1, 3)
    q = jax.random.normal(kq, (bs, seq, d_k), dtype=jnp.float32)
    k = jax.random.normal(kk, (bs, seq, d_k), dtype=jnp.float32)
    v = jax.random.normal(kv, (bs, seq, d_v), dtype=jnp.float32)
    valid_lens = jnp.array([3, 6], dtype=jnp.int32)
    ref = _reference(q, k, v, valid_lens)

    out = jax.block_until_ready(scaled_dot_product_attention(q, k, v, valid_lens))
    assert out.shape == (bs, seq, d_v)
    assert jnp.allclose(out, ref, atol=2e-2, rtol=2e-2), \
        f"case1/bf16 max abs err {jnp.max(jnp.abs(out - ref))}"

    out_f32 = jax.block_until_ready(
        scaled_dot_product_attention(q, k, v, valid_lens, use_bf16_matmul=False))
    assert jnp.allclose(out_f32, ref, atol=2e-3, rtol=2e-3), \
        f"case1/f32 max abs err {jnp.max(jnp.abs(out_f32 - ref))}"

    out_nm = jax.block_until_ready(scaled_dot_product_attention(q, k, v, None))
    ref_nm = _reference(q, k, v, None)
    assert jnp.allclose(out_nm, ref_nm, atol=2e-2, rtol=2e-2), \
        f"case1/nomask max abs err {jnp.max(jnp.abs(out_nm - ref_nm))}"

    # ---- Case 2: larger shapes, auto tile selection --------------------------
    bs2, seq2, dk2, dv2 = 2, 256, 64, 128
    kq2, kk2, kv2 = jax.random.split(key2, 3)
    q2 = jax.random.normal(kq2, (bs2, seq2, dk2), dtype=jnp.float32)
    k2 = jax.random.normal(kk2, (bs2, seq2, dk2), dtype=jnp.float32)
    v2 = jax.random.normal(kv2, (bs2, seq2, dv2), dtype=jnp.float32)
    vl2 = jnp.array([100, 256], dtype=jnp.int32)
    ref2 = _reference(q2, k2, v2, vl2)

    out2 = jax.block_until_ready(scaled_dot_product_attention(q2, k2, v2, vl2))
    assert jnp.allclose(out2, ref2, atol=2e-2, rtol=2e-2), \
        f"case2 max abs err {jnp.max(jnp.abs(out2 - ref2))}"

    # ---- Case 3: force the KV-tiled (flash) path + valid_len tile skipping ---
    out3 = jax.block_until_ready(
        scaled_dot_product_attention(q2, k2, v2, vl2, q_tile=128, kv_tile=128))
    assert jnp.allclose(out3, ref2, atol=2e-2, rtol=2e-2), \
        f"case3 max abs err {jnp.max(jnp.abs(out3 - ref2))}"

    print("KERNEL_OK")
</pallas_src>

<mosaic_0001>
module attributes {stable_mosaic.version = 11 : i64} {
  func.func @_sdpa_kernel(%arg0: i32, %arg1: i32, %arg2: i32, %arg3: memref<2xi32, #tpu.memory_space<smem>>, %arg4: memref<1x8x32xf32, #tpu.memory_space<vmem>>, %arg5: memref<1x8x32xf32, #tpu.memory_space<vmem>>, %arg6: memref<1x8x32xf32, #tpu.memory_space<vmem>>, %arg7: memref<1x8x32xf32, #tpu.memory_space<vmem>>, %arg8: memref<8x1xf32, #tpu.memory_space<vmem>>, %arg9: memref<8x1xf32, #tpu.memory_space<vmem>>, %arg10: memref<8x32xf32, #tpu.memory_space<vmem>>) attributes {dimension_semantics = [#tpu.dimension_semantics<parallel>, #tpu.dimension_semantics<arbitrary>, #tpu.dimension_semantics<arbitrary>], iteration_bounds = array<i64: 2, 1, 1>, scalar_prefetch = 1 : i64, scratch_operands = 3 : i64, tpu.core_type = #tpu.core_type<tc>, window_params = [{transform_indices = @transform_0, window_bounds = array<i64: 1, 8, 32>}, {transform_indices = @transform_1, window_bounds = array<i64: 1, 8, 32>}, {transform_indices = @transform_2, window_bounds = array<i64: 1, 8, 32>}, {transform_indices = @transform_3, window_bounds = array<i64: 1, 8, 32>}]} {
    %c0_i32 = arith.constant 0 : i32
    %0 = arith.cmpi eq, %arg2, %c0_i32 : i32
    %1 = arith.extui %0 : i1 to i32
    %c0_i32_0 = arith.constant 0 : i32
    %2 = arith.cmpi ne, %1, %c0_i32_0 : i32
    scf.if %2 {
      %cst = arith.constant 0xFF800000 : f32
      %14 = vector.broadcast %cst : f32 to vector<8x1xf32>
      %c0 = arith.constant 0 : index
      %c0_5 = arith.constant 0 : index
      %15 = vector.load %arg8[%c0, %c0_5] : memref<8x1xf32, #tpu.memory_space<vmem>>, vector<8x1xf32>
      tpu.vector_store %arg8[%c0, %c0_5], %14 {strides = array<i32>} : memref<8x1xf32, #tpu.memory_space<vmem>>, vector<8x1xf32>,
      %cst_6 = arith.constant 0.000000e+00 : f32
      %16 = vector.broadcast %cst_6 : f32 to vector<8x1xf32>
      %c0_7 = arith.constant 0 : index
      %c0_8 = arith.constant 0 : index
      %17 = vector.load %arg9[%c0_7, %c0_8] : memref<8x1xf32, #tpu.memory_space<vmem>>, vector<8x1xf32>
      tpu.vector_store %arg9[%c0_7, %c0_8], %16 {strides = array<i32>} : memref<8x1xf32, #tpu.memory_space<vmem>>, vector<8x1xf32>,
      %cst_9 = arith.constant 0.000000e+00 : f32
      %18 = vector.broadcast %cst_9 : f32 to vector<8x32xf32>
      %c0_10 = arith.constant 0 : index
      %c0_11 = arith.constant 0 : index
      %19 = vector.load %arg10[%c0_10, %c0_11] : memref<8x32xf32, #tpu.memory_space<vmem>>, vector<8x32xf32>
      tpu.vector_store %arg10[%c0_10, %c0_11], %18 {strides = array<i32>} : memref<8x32xf32, #tpu.memory_space<vmem>>, vector<8x32xf32>,
    } else {
    }
    %3 = arith.index_cast %arg0 : i32 to index
    %4 = memref.load %arg3[%3] : memref<2xi32, #tpu.memory_space<smem>>
    %c8_i32 = arith.constant 8 : i32
    %5 = arith.muli %arg2, %c8_i32 : i32
    %6 = arith.cmpi slt, %5, %4 : i32
    %c0_i32_1 = arith.constant 0 : i32
    %7 = arith.cmpi sle, %4, %c0_i32_1 : i32
    %8 = arith.ori %6, %7 : i1
    %9 = arith.extui %8 : i1 to i32
    %c0_i32_2 = arith.constant 0 : i32
    %10 = arith.cmpi ne, %9, %c0_i32_2 : i32
    scf.if %10 {
      %c0 = arith.constant 0 : index
      %c0_5 = arith.constant 0 : index
      %c0_6 = arith.constant 0 : index
      %14 = vector.load %arg4[%c0, %c0_5, %c0_6] : memref<1x8x32xf32, #tpu.memory_space<vmem>>, vector<1x8x32xf32>
      %15 = vector.shape_cast %14 : vector<1x8x32xf32> to vector<8x32xf32>
      %cst = arith.constant 0.176776692 : f32
      %16 = vector.broadcast %cst : f32 to vector<8x32xf32>
      %17 = arith.mulf %15, %16 : vector<8x32xf32>
      %18 = arith.truncf %17 : vector<8x32xf32> to vector<8x32xbf16>
      %c0_7 = arith.constant 0 : index
      %c0_8 = arith.constant 0 : index
      %c0_9 = arith.constant 0 : index
      %19 = vector.load %arg5[%c0_7, %c0_8, %c0_9] : memref<1x8x32xf32, #tpu.memory_space<vmem>>, vector<1x8x32xf32>
      %20 = vector.shape_cast %19 : vector<1x8x32xf32> to vector<8x32xf32>
      %21 = arith.truncf %20 : vector<8x32xf32> to vector<8x32xbf16>
      %cst_10 = arith.constant dense<0.000000e+00> : vector<8x8xf32>
      %22 = tpu.matmul %18, %21, %cst_10 {dimension_numbers = #tpu.dot_dimension_numbers<[1], [1], [0], [0], [0, 0, 1, 0], [], []>} : vector<8x32xbf16>, vector<8x32xbf16>, vector<8x8xf32> -> vector<8x8xf32>
      %23 = tpu.iota {dimensions = array<i32: 1>} : vector<1x8xi32>
      %24 = vector.broadcast %5 : i32 to vector<1x8xi32>
      %25 = arith.addi %24, %23 : vector<1x8xi32>
      %26 = vector.broadcast %4 : i32 to vector<1x8xi32>
      %27 = arith.cmpi slt, %25, %26 : vector<1x8xi32>
      %cst_11 = arith.constant -1.000000e+06 : f32
      %28 = vector.shape_cast %27 : vector<1x8xi1> to vector<1x8xi1>
      %29 = vector.broadcast %28 : vector<1x8xi1> to vector<8x8xi1>
      %30 = vector.broadcast %cst_11 : f32 to vector<8x8xf32>
      %31 = arith.select %29, %22, %30 : vector<8x8xi1>, vector<8x8xf32>
      %c0_12 = arith.constant 0 : index
      %c0_13 = arith.constant 0 : index
      %32 = vector.load %arg8[%c0_12, %c0_13] : memref<8x1xf32, #tpu.memory_space<vmem>>, vector<8x1xf32>
      %cst_14 = arith.constant dense<0xFF800000> : vector<8xf32>
      %33 = vector.multi_reduction <maximumf>, %31, %cst_14 [1] : vector<8x8xf32> to vector<8xf32>
      %34 = vector.shape_cast %33 : vector<8xf32> to vector<8x1xf32>
      %35 = arith.maximumf %32, %34 : vector<8x1xf32>
      %36 = arith.subf %32, %35 : vector<8x1xf32>
      %37 = math.exp %36 : vector<8x1xf32>
      %38 = vector.broadcast %35 : vector<8x1xf32> to vector<8x8xf32>
      %39 = arith.subf %31, %38 : vector<8x8xf32>
      %40 = math.exp %39 : vector<8x8xf32>
      %c0_15 = arith.constant 0 : index
      %c0_16 = arith.constant 0 : index
      %41 = vector.load %arg9[%c0_15, %c0_16] : memref<8x1xf32, #tpu.memory_space<vmem>>, vector<8x1xf32>
      %42 = arith.mulf %37, %41 : vector<8x1xf32>
      %cst_17 = arith.constant dense<0.000000e+00> : vector<8xf32>
      %43 = vector.multi_reduction <add>, %40, %cst_17 [1] : vector<8x8xf32> to vector<8xf32>
      %44 = vector.shape_cast %43 : vector<8xf32> to vector<8x1xf32>
      %45 = arith.addf %42, %44 : vector<8x1xf32>
      %c0_18 = arith.constant 0 : index
      %c0_19 = arith.constant 0 : index
      %46 = vector.load %arg9[%c0_18, %c0_19] : memref<8x1xf32, #tpu.memory_space<vmem>>, vector<8x1xf32>
      tpu.vector_store %arg9[%c0_18, %c0_19], %45 {strides = array<i32>} : memref<8x1xf32, #tpu.memory_space<vmem>>, vector<8x1xf32>,
      %47 = arith.truncf %40 : vector<8x8xf32> to vector<8x8xbf16>
      %c0_20 = arith.constant 0 : index
      %c0_21 = arith.constant 0 : index
      %c0_22 = arith.constant 0 : index
      %48 = vector.load %arg6[%c0_20, %c0_21, %c0_22] : memref<1x8x32xf32, #tpu.memory_space<vmem>>, vector<1x8x32xf32>
      %49 = vector.shape_cast %48 : vector<1x8x32xf32> to vector<8x32xf32>
      %50 = arith.truncf %49 : vector<8x32xf32> to vector<8x32xbf16>
      %cst_23 = arith.constant dense<0.000000e+00> : vector<8x32xf32>
      %51 = tpu.matmul %47, %50, %cst_23 {dimension_numbers = #tpu.dot_dimension_numbers<[1], [0], [0], [1], [0, 0, 1, 1], [], []>} : vector<8x8xbf16>, vector<8x32xbf16>, vector<8x32xf32> -> vector<8x32xf32>
      %c0_24 = arith.constant 0 : index
      %c0_25 = arith.constant 0 : index
      %52 = vector.load %arg10[%c0_24, %c0_25] : memref<8x32xf32, #tpu.memory_space<vmem>>, vector<8x32xf32>
      %53 = vector.broadcast %37 : vector<8x1xf32> to vector<8x32xf32>
      %54 = arith.mulf %53, %52 : vector<8x32xf32>
      %55 = arith.addf %54, %51 : vector<8x32xf32>
      %c0_26 = arith.constant 0 : index
      %c0_27 = arith.constant 0 : index
      %56 = vector.load %arg10[%c0_26, %c0_27] : memref<8x32xf32, #tpu.memory_space<vmem>>, vector<8x32xf32>
      tpu.vector_store %arg10[%c0_26, %c0_27], %55 {strides = array<i32>} : memref<8x32xf32, #tpu.memory_space<vmem>>, vector<8x32xf32>,
      %c0_28 = arith.constant 0 : index
      %c0_29 = arith.constant 0 : index
      %57 = vector.load %arg8[%c0_28, %c0_29] : memref<8x1xf32, #tpu.memory_space<vmem>>, vector<8x1xf32>
      tpu.vector_store %arg8[%c0_28, %c0_29], %35 {strides = array<i32>} : memref<8x1xf32, #tpu.memory_space<vmem>>, vector<8x1xf32>,
    } else {
    }
    %c0_i32_3 = arith.constant 0 : i32
    %11 = arith.cmpi eq, %arg2, %c0_i32_3 : i32
    %12 = arith.extui %11 : i1 to i32
    %c0_i32_4 = arith.constant 0 : i32
    %13 = arith.cmpi ne, %12, %c0_i32_4 : i32
    scf.if %13 {
      %c0 = arith.constant 0 : index
      %c0_5 = arith.constant 0 : index
      %14 = vector.load %arg9[%c0, %c0_5] : memref<8x1xf32, #tpu.memory_space<vmem>>, vector<8x1xf32>
      %15 = tpu.reciprocal %14 {approx = true} : vector<8x1xf32> -> vector<8x1xf32>
      %c0_6 = arith.constant 0 : index
      %c0_7 = arith.constant 0 : index
      %16 = vector.load %arg10[%c0_6, %c0_7] : memref<8x32xf32, #tpu.memory_space<vmem>>, vector<8x32xf32>
      %17 = vector.broadcast %15 : vector<8x1xf32> to vector<8x32xf32>
      %18 = arith.mulf %16, %17 : vector<8x32xf32>
      %c0_8 = arith.constant 0 : index
      %c0_9 = arith.constant 0 : index
      %c0_10 = arith.constant 0 : index
      %19 = vector.load %arg7[%c0_8, %c0_9, %c0_10] : memref<1x8x32xf32, #tpu.memory_space<vmem>>, vector<1x8x32xf32>
      %20 = vector.shape_cast %19 : vector<1x8x32xf32> to vector<8x32xf32>
      %21 = vector.shape_cast %18 : vector<8x32xf32> to vector<1x8x32xf32>
      tpu.vector_store %arg7[%c0_8, %c0_9, %c0_10], %21 {strides = array<i32>} : memref<1x8x32xf32, #tpu.memory_space<vmem>>, vector<1x8x32xf32>,
    } else {
    }
    return
  }
  func.func @transform_0(%arg0: i32, %arg1: i32, %arg2: i32, %arg3: memref<2xi32, #tpu.memory_space<smem>>) -> (i32, i32, i32) {
    %c0_i32 = arith.constant 0 : i32
    %c0_i32_0 = arith.constant 0 : i32
    return %arg0, %arg1, %c0_i32 : i32, i32, i32
  }
  func.func @transform_1(%arg0: i32, %arg1: i32, %arg2: i32, %arg3: memref<2xi32, #tpu.memory_space<smem>>) -> (i32, i32, i32) {
    %c0_i32 = arith.constant 0 : i32
    %c0_i32_0 = arith.constant 0 : i32
    return %arg0, %arg2, %c0_i32 : i32, i32, i32
  }
  func.func @transform_2(%arg0: i32, %arg1: i32, %arg2: i32, %arg3: memref<2xi32, #tpu.memory_space<smem>>) -> (i32, i32, i32) {
    %c0_i32 = arith.constant 0 : i32
    %c0_i32_0 = arith.constant 0 : i32
    return %arg0, %arg2, %c0_i32 : i32, i32, i32
  }
  func.func @transform_3(%arg0: i32, %arg1: i32, %arg2: i32, %arg3: memref<2xi32, #tpu.memory_space<smem>>) -> (i32, i32, i32) {
    %c0_i32 = arith.constant 0 : i32
    %c0_i32_0 = arith.constant 0 : i32
    return %arg0, %arg1, %c0_i32 : i32, i32, i32
  }
}

</mosaic_0001>

<bundles_post_ra>
// kernel: tpu_custom_call.1
= control target key start
LH: loop header
LB: loop body
LE: loop exit
PB: predicated region body
PF: predicated region fallthrough
CT: control target
= control target key end

     0   :  { %s1260_s0 = inlined_call_operand.hbm [shape: s32[2], index: 0, kind: input, shape index: {}]   ;;  %s1261_s1 = inlined_call_operand.hbm [shape: f32[2,8,32], index: 1, kind: input, shape index: {}]   ;;  %s1262_s2 = inlined_call_operand.hbm [shape: f32[2,8,32], index: 2, kind: input, shape index: {}]   ;;  %s1263_s3 = inlined_call_operand.hbm [shape: f32[2,8,32], index: 3, kind: input, shape index: {}]   ;;  %s1264_s4 = inlined_call_operand.hbm [shape: f32[2,8,32], index: 4, kind: output, shape index: {}]  }
   0x1   :  { %1270 = sst [smem:[#allocation21_spill]] %s1262_s2  ;;  %s739_s17 = scalar_lea.hbm %s1260_s0, 16 }
   0x2   :  { %p740_p0 = scmp.ne.s32.totalorder %s1260_s0, %s739_s17  ;;  %p743_p1 = scmp.lt.u32.totalorder %s739_s17, %s1260_s0 }
   0x4   :  { %p745_p2 = pnand %p743_p1, %p740_p0 }
   0x6   :  { %748 = shalt.err (!%p745_p2)  }
   0x7   :  { %s929_s22 = smov [#allocation6]  }
   0x8   :  { %10 = dma.hbm_to_smem %s1260_s0, 16, %s929_s22, [#allocation5] }
   0x9   :  { %891 = dma.done.wait [#allocation5], 16 }
   0xa   :  { %892 = vsyncadd [#allocation5], 4294967280 }
   0xb   :  { %12 = sfence }
   0xc   :  { %13 = vsyncpa [#allocation8], 0 }
   0xd   :  { %15 = vsyncpa [#allocation8 + $0x1], 0 }
   0xe   :  { %16 = vsyncpa [#allocation11], 0 }
   0xf   :  { %18 = vsyncpa [#allocation11 + $0x1], 0 }
  0x10   :  { %19 = vsyncpa [#allocation9], 0 }
  0x11   :  { %21 = vsyncpa [#allocation9 + $0x1], 0  ;;  %s977_s25 = smov 0   ;;  %s979_s26 = smov 0  }
  0x12   :  { %s981_s27 = smov 0   ;;  %s983_s28 = smov 0  }
  0x13   :  { %s985_s29 = smov 0   ;;  %s987_s0 = smov 0  }
  0x14 LB: > { %1271 = sst [smem:[#allocation18_spill]] %s923_s29  ;;  %s1008_s30 = sadd.s32 4294967295, %s927_s0   ;;  %s927_s0 = sphi %s987_s0, %s27_s0   ;;  %s923_s29 = sphi %s985_s29, %s1292_s29   ;;  %s919_s28 = sphi %s983_s28, %s1291_s28   ;;  %s915_s27 = sphi %s981_s27, %s1295_s27   ;;  %s911_s26 = sphi %s979_s26, %s1294_s26   ;;  %s907_s25 = sphi %s977_s25, %s1293_s25  }
  0x15   : > { %s614_s5 = sadd.s32 4294967294, %s927_s0   ;;  %s46_s6 = sadd.s32 1, %s923_s29 }
  0x16   : > { %s55_s7 = sadd.s32 1, %s915_s27  ;;  %p48_p3 = scmp.ge.s32.totalorder %s46_s6, 2 }
  0x17   : > { %p62_p4 = scmp.ne.s32.totalorder %s915_s27, %s911_s26  ;;  %p63_p5 = scmp.eq.s32.totalorder %s927_s0, 0 }
  0x18   : > { %p68_p6 = scmp.ne.s32.totalorder %s911_s26, %s907_s25  ;;  %s1297_s6 = smov (%p48_p3, %s46_s6), 0 }
  0x19   : > { %1272 = sst [smem:[#allocation19_spill]] %s1297_s6  ;;  %p1020_p7 = por %p63_p5, %p62_p4 }
  0x1a   : > { %p69_p8 = scmp.eq.s32.totalorder %s1008_s30, 0  ;;  %s50_s9 = ssub.s32 %s923_s29, %s1297_s6 }
  0x1b   : > { %p150_p9 = scmp.eq.s32.totalorder %s1008_s30, 1  ;;  %p53_p10 = scmp.eq.s32.totalorder %s50_s9, 0 }
  0x1c   : > { %p1028_p11 = por %p69_p8, %p68_p6  ;;  %p156_p13 = scmp.eq.s32.totalorder %s614_s5, 1 }
  0x1d   : > { %p1032_p12 = por %p150_p9, %p62_p4  ;;  %p673_p2 = scmp.lt.s32.totalorder %s927_s0, 2 }
  0x1e   : > { %s1274_s10 = scalar_select %p1028_p11, 1, 0 }
  0x1f   : > { %s1275_s11 = scalar_select %p1032_p12, 1, 0 }
  0x20   : > { %s1037_s12 = scalar_select %p53_p10, %s915_s27, %s55_s7  }
  0x21   : > { %p1039_p0 = por %p156_p13, %p68_p6  ;;  %s176_s14 = sand.u32 1, %s915_s27  }
  0x22   : > { %1276 = sst [smem:[#allocation20_spill]] %s1037_s12  ;;  %s1048_s15 = sshll.u32 %s176_s14, 3 }
  0x23   : > { %s1277_s13 = scalar_select %p1039_p0, 1, 0 }
  0x24   : > { %s1051_s16 = sshll.u32 %s923_s29, 7  ;;  %p1055_p3 = pnand %p673_p2, %p1020_p7 }
  0x25   : > { %s195_s18 = sand.u32 1, %s927_s0   ;;  %s1279_s2 = sld [smem:[#allocation21_spill]] }
  0x26   : > { %s1278_s17 = scalar_select %p1055_p3, 1, 0 }
  0x27   : > { %s199_s22 = scalar_lea.vmem [#allocation10], %s1048_s15  ;;  %s1071_s24 = scalar_lea.sflag [#allocation11], %s195_s18 }
  0x28   : > { %s207_s23 = sshll.u32 %s199_s22, 4  ;;  %p1077_p7 = pneg %p1055_p3  ;;  %s1068_s23 = int_to_ptr.vmem [resolvable:$true] %s207_s23 }
  0x2b   : > { %s1064_s21 = scalar_lea.hbm %s1279_s2, %s1051_s16  ;;  %s754_s19 = scalar_lea.hbm %s1279_s2, 256 }
  0x2c   : > { %s749_s5 = scalar_lea.hbm %s1064_s21, 128  ;;  %p755_p10 = scmp.lt.u32.totalorder %s1064_s21, %s1279_s2 }
  0x2d   : > { %p750_p6 = scmp.ne.s32.totalorder %s1064_s21, %s749_s5  ;;  %p756_p13 = scmp.lt.u32.totalorder %s754_s19, %s749_s5 }
  0x2e   : > { %p758_p1 = scmp.lt.u32.totalorder %s749_s5, %s1064_s21 }
  0x2f   : > { %p752_p8 = pnand %p1077_p7, %p750_p6  ;;  %p757_p2 = por %p756_p13, %p755_p10 }
  0x31   : > { %p753_p9 = pneg %p752_p8  ;;  %p759_p4 = por %p758_p1, %p757_p2 }
  0x33   : > { %p760_p5 = pnand %p759_p4, %p753_p9 }
  0x35   : > { %763 = shalt.err (!%p760_p5)
}
  0x36   : > { %s764_s18 = scalar_lea.vmem %s1068_s23, 128  ;;  %s930_s8 = smov [#allocation10]  }
  0x37   : > { %p765_p6 = scmp.ne.s32.totalorder %s1068_s23, %s764_s18  ;;  %s769_s9 = sshll.u32 %s930_s8, 4  ;;  %s770_s9 = int_to_ptr.vmem [resolvable:$false] %s769_s9 }
  0x38   : > { %s771_s20 = scalar_lea.vmem %s770_s9, 256  ;;  %p772_p12 = scmp.lt.s32.totalorder %s1068_s23, %s770_s9 }
  0x39   : > { %p767_p8 = pnand %p765_p6, %p1077_p7  ;;  %p773_p11 = scmp.lt.s32.totalorder %s771_s20, %s764_s18 }
  0x3b   : > { %p768_p0 = pneg %p767_p8  ;;  %p774_p10 = por %p773_p11, %p772_p12 }
  0x3d   : > { %p775_p13 = pnand %p774_p10, %p768_p0 }
  0x3f   : > { %778 = shalt.err (!%p775_p13)
}
  0x40   : > { %665 = dma.hbm_to_vmem [thread:$0]  (!%p1055_p3), %s1064_s21, 128, %s1068_s23, %s1071_s24  }
  0x41   : > { %p1281_p1 = scmp.lt.s32.totalorder %s927_s0, 3  ;;  %p1282_p4 = scmp.ge.s32.totalorder %s927_s0, 1 }
  0x42   : > { %s1113_s18 = scalar_lea.hbm %s1261_s1, %s1051_s16  ;;  %s180_s8 = scalar_lea.vmem [#allocation7], %s1048_s15 }
  0x43   : > { %p1105_p5 = pnand %p1282_p4, %p1281_p1  ;;  %s188_s9 = sshll.u32 %s180_s8, 4  ;;  %s1116_s9 = int_to_ptr.vmem [resolvable:$true] %s188_s9 }
  0x44   : > { %s1122_s20 = scalar_lea.hbm %s1263_s3, %s1051_s16  ;;  %s177_s2 = scalar_lea.sflag [#allocation8], %s176_s14 }
  0x45   : > { %s1283_s5 = scalar_select %p1105_p5, 1, 0 }
  0x46   : > { %s779_s6 = scalar_lea.hbm %s1113_s18, 128  ;;  %s784_s29 = scalar_lea.hbm %s1261_s1, 256 }
  0x47   : > { %p780_p11 = scmp.ne.s32.totalorder %s1113_s18, %s779_s6  ;;  %p785_p9 = scmp.lt.u32.totalorder %s1113_s18, %s1261_s1 }
  0x48   : > { %p786_p2 = scmp.lt.u32.totalorder %s784_s29, %s779_s6  ;;  %p788_p8 = scmp.lt.u32.totalorder %s779_s6, %s1113_s18 }
  0x49   : > { %p782_p12 = pnand %p780_p11, %p1077_p7 }
  0x4a   : > { %p787_p6 = por %p786_p2, %p785_p9 }
  0x4b   : > { %p783_p0 = pneg %p782_p12 }
  0x4c   : > { %p789_p10 = por %p788_p8, %p787_p6 }
  0x4e   : > { %p790_p13 = pnand %p789_p10, %p783_p0 }
  0x50   : > { %793 = shalt.err (!%p790_p13)
}
  0x51   : > { %s794_s14 = scalar_lea.vmem %s1116_s9, 128  ;;  %s931_s16 = smov [#allocation7]  }
  0x52   : > { %p795_p1 = scmp.ne.s32.totalorder %s1116_s9, %s794_s14  ;;  %s799_s21 = sshll.u32 %s931_s16, 4  ;;  %s800_s21 = int_to_ptr.vmem [resolvable:$false] %s799_s21 }
  0x53   : > { %s801_s12 = scalar_lea.vmem %s800_s21, 256  ;;  %p802_p12 = scmp.lt.s32.totalorder %s1116_s9, %s800_s21 }
  0x54   : > { %p797_p4 = pnand %p795_p1, %p1077_p7  ;;  %p803_p5 = scmp.lt.s32.totalorder %s801_s12, %s794_s14 }
  0x56   : > { %p798_p11 = pneg %p797_p4  ;;  %p804_p9 = por %p803_p5, %p802_p12 }
  0x58   : > { %p805_p2 = pnand %p804_p9, %p798_p11 }
  0x5a   : > { %808 = shalt.err (!%p805_p2)
}
  0x5b   : > { %662 = dma.hbm_to_vmem [thread:$0]  (!%p1055_p3), %s1113_s18, 128, %s1116_s9, %s177_s2  }
  0x5c   : > { %s218_s29 = scalar_lea.vmem [#allocation12], %s1048_s15  ;;  %s809_s23 = scalar_lea.hbm %s1122_s20, 128 }
  0x5d   : > { %s226_s6 = sshll.u32 %s218_s29, 4  ;;  %p810_p0 = scmp.ne.s32.totalorder %s1122_s20, %s809_s23  ;;  %s227_s6 = int_to_ptr.vmem [resolvable:$true] %s226_s6 }
  0x5e   : > { %s814_s8 = scalar_lea.hbm %s1263_s3, 256  ;;  %p815_p8 = scmp.lt.u32.totalorder %s1122_s20, %s1263_s3 }
  0x5f   : > { %p812_p5 = pnand %p810_p0, %p1077_p7  ;;  %p816_p10 = scmp.lt.u32.totalorder %s814_s8, %s809_s23 }
  0x60   : > { %p818_p1 = scmp.lt.u32.totalorder %s809_s23, %s1122_s20 }
  0x61   : > { %p813_p6 = pneg %p812_p5  ;;  %p817_p13 = por %p816_p10, %p815_p8 }
  0x63   : > { %p819_p4 = por %p818_p1, %p817_p13 }
  0x65   : > { %p820_p11 = pnand %p819_p4, %p813_p6 }
  0x67   : > { %823 = shalt.err (!%p820_p11)
}
  0x68   : > { %s824_s2 = scalar_lea.vmem %s227_s6, 128  ;;  %s932_s15 = smov [#allocation12]  }
  0x69   : > { %p825_p12 = scmp.ne.s32.totalorder %s227_s6, %s824_s2  ;;  %s829_s18 = sshll.u32 %s932_s15, 4  ;;  %s830_s18 = int_to_ptr.vmem [resolvable:$false] %s829_s18 }
  0x6a   : > { %s831_s9 = scalar_lea.vmem %s830_s18, 256  ;;  %p832_p0 = scmp.lt.s32.totalorder %s227_s6, %s830_s18 }
  0x6b   : > { %p827_p9 = pnand %p825_p12, %p1077_p7  ;;  %p833_p5 = scmp.lt.s32.totalorder %s831_s9, %s824_s2 }
  0x6d   : > { %p828_p2 = pneg %p827_p9  ;;  %p834_p3 = por %p833_p5, %p832_p0 }
  0x6f   : > { %p835_p8 = pnand %p834_p3, %p828_p2 }
  0x71   : > { %838 = shalt.err (!%p835_p8)
}
  0x72   : > { %p1284_p10 = scmp.ne.s32.totalorder %s1278_s17, 0  ;;  %p1285_p6 = scmp.ne.s32.totalorder %s1283_s5, 0 }
  0x73   : > { %s1169_s7 = sand.u32 (!%p1285_p6), 1, %s911_s26   ;;  %p1286_p3 = scmp.ne.s32.totalorder (!%p1285_p6), %s1274_s10, 0 }
  0x74   : > { %668 = dma.hbm_to_vmem [thread:$0]  (!%p1284_p10), %s1122_s20, 128, %s227_s6, %s1071_s24  }
  0x75   : > { %235 = sbr.rel (%p1285_p6) target bundleno = 1022 (0x3fe), region = 32  ;;  %s1172_s21 = sshll.u32 (!%p1285_p6), %s1169_s7, 3 }
  0x76   : > { %s238_s12 = scalar_lea.sflag (!%p1285_p6), [#allocation8], %s1169_s7  ;;  %s241_s29 = scalar_lea.vmem (!%p1285_p6), [#allocation7], %s1172_s21 }
  0x7c   : > { %894 = dma.done.wait (%p1286_p3), %s238_s12, 128  }
  0x7d   : > { %896 = vsyncadd (%p1286_p3), %s238_s12, 4294967168  ;;  %s246_s17 = sand.u32 1, %s1008_s30   ;;  %s250_s5 = scalar_lea.vmem [#allocation10], %s1172_s21 }
  0x7e   : > { %s247_s24 = scalar_lea.sflag [#allocation11], %s246_s17 }
  0x7f   : > { %898 = dma.done.wait (%p1286_p3), %s247_s24, 256  }
  0x80   : > { %900 = vsyncadd (%p1286_p3), %s247_s24, 4294967040  ;;  %vm297_vm0 = vcmask 7168   ;;  %s302_s20 = sld [smem:[#allocation6 + %s919_s28]]  ;;  %v933_v0 = vmov -inf   ;;  %v934_v1 = vmov 0.0   ;;  %vm300_vm1 = vcmask 261120  }
  0x81   : > { %298 = vst.msk [vmem:[#allocation2] sm:$0xff] %vm297_vm0, %v933_v0  ;;  %299 = vst.msk [vmem:[#allocation3] sm:$0xff] %vm297_vm0, %v934_v1  ;;  %s259_s30 = scalar_lea.vmem [#allocation12], %s1172_s21  ;;  %s291_s10 = scalar_lea.vmem [#allocation13], %s1172_s21 }
  0x82   : > { %301 = vst.msk [vmem:[#allocation4] sm:$0xff] %vm300_vm1, %v934_v1 }
  0x86   : > { %p628_p7 = scmp.gt.s32.totalorder %s302_s20, 0  ;;  %p305_p13 = scmp.le.s32.totalorder %s302_s20, 0 }
  0x88   : > { %p306_p1 = por %p628_p7, %p305_p13 }
  0x89   : > { %v313_v2 = vld [vmem:[%s250_s5] sm:$0xff] (%p306_p1)  ;;  %v310_v3 = vld [vmem:[%s241_s29] sm:$0xff] (%p306_p1)  ;;  %v935_v4 = vmov (%p306_p1), 0.0   ;;  %vm936_vm2 = vmmov (%p306_p1), 0   ;;  %v362_v9 = vlaneseq (%p306_p1)  ;;  %v366_v11 = vstv (%p306_p1), %s302_s20 }
  0x8a   : > { %309 = sbr.rel (!%p306_p1) target bundleno = 866 (0x362), region = 52  ;;  %639 = vmatprep.subr.bf16.mxu0 (%p306_p1), %v935_v4  ;;  %v314_v5 = vpack.c.bf16 (%p306_p1), %v313_v2, %v313_v2  ;;  %641 = vmatprep.mubr.msk.bf16.mxu0 (%p306_p1), %vm936_vm2, %v935_v4  ;;  %v311_v7 = vmul.f32 (%p306_p1), 0.17677669, %v310_v3  ;;  %vm372_vm4 = vcmask (%p306_p1), 64512   ;;  %v937_v18 = vmov (%p306_p1), 0   ;;  %v371_v19 = vld [vmem:[#allocation2] sm:$0xff] (%p306_p1) }
  0x8b   : > { %645 = vmatprep.subr.bf16.mxu1 (%p306_p1), %v935_v4  ;;  %647 = vmatprep.mubr.msk.bf16.mxu1 (%p306_p1), %vm936_vm2, %v935_v4  ;;  %v363_v10 = vand.u32 (%p306_p1), 127, %v362_v9  ;;  %v397_v23 = vld [vmem:[%s259_s30] sm:$0xff] (%p306_p1)  ;;  %vm402_vm5 = vcmask (%p306_p1), 1043456   ;;  %v388_v34 = vld [vmem:[#allocation3] sm:$0xff] (%p306_p1)  ;;  %v446_v38 = vld [vmem:[#allocation4] sm:$0xff] (%p306_p1) }
  0x8c   : > { %v320_v6 = vsel (%p306_p1), %vm300_vm1, %v314_v5, 0  ;;  %v312_v8 = vpack.c.bf16 (%p306_p1), %v311_v7, %v311_v7  ;;  %730 = vset.pattern.permute.xlu0 (%p306_p1), %v937_v18  ;;  %731 = vset.pattern.permute.xlu1 (%p306_p1), %v937_v18  ;;  %v398_v24 = vpack.c.bf16 (%p306_p1), %v397_v23, %v397_v23 }
  0x8d   : > { %640 = vmatpush3.bf16.xpose.msra.mxu0 (%p306_p1), %v320_v6  ;;  %vm367_vm3 = vcmp.lt.s32.totalorder (%p306_p1), %v363_v10, %v366_v11 }
  0x8e   : > { %v404_v25 = vsel (%p306_p1), %vm402_vm5, %v398_v24, 0 }
  0x8f   : > { %646 = vmatpush3.bf16.msra.mxu1 (%p306_p1), %v404_v25 }
  0x94   : > { %642 = vmatmul.mubr.msk.bf16.vlgmr.msra.gmra.mrb[0].mxu0 %vm300_vm1, %v312_v8 }
 0x167   : > { %v356_v12 = vpop.f32.mrb[0].mxu0 }
 0x168   : > { %v370_v13 = vsel %vm367_vm3, %v356_v12, -1000000.0  ;;  %v643_v14 = vpop.f32.mrb[1].mxu0 }
 0x169   : > { %v359_v15 = vpop.f32.mrb[2].mxu0  ;;  %v373_v16 = vsel %vm372_vm4, %v370_v13, -inf }
 0x16a   : > { %374 = vmax.xlane.f32.xlu0 %v373_v16  ;;  %v644_v17 = vpop.f32.mrb[3].mxu0 }
 0x1f7   : > { %v375_v20 = vpop.xlane.xlu0 %374 }
 0x1f8   : > { %v376_v21 = vmax.f32 %v371_v19, %v375_v20 }
 0x1fa   : > { %v377_v22 = vsub.f32 %v371_v19, %v376_v21  ;;  %455 = vst.msk [vmem:[#allocation2] sm:$0xff] %vm297_vm0, %v376_v21  ;;  %382 = vperm.xlu0 %730, %v376_v21  }
 0x1fc   : > { %v378_v32 = vmul.f32 1.442695, %v377_v22 }
 0x279   : > { %v383_v26 = vpop.permute.xlu0 %382 }
 0x27a   : > { %v385_v27 = vsub.f32 %v370_v13, %v383_v26 }
 0x27c   : > { %v386_v28 = vmul.f32 1.442695, %v385_v27 }
 0x27e   : > { %732 = vpow2.f32 %v386_v28 }
 0x27f   : > { %734 = vpow2.f32 %v378_v32 }
 0x288   : > { %v733_v29 = vpop.eup %732 }
 0x289   : > { %v390_v30 = vsel %vm372_vm4, %v733_v29, 0.0  ;;  %v396_v31 = vpack.c.bf16 %v733_v29, %v733_v29  ;;  %v735_v33 = vpop.eup %734 }
 0x28a   : > { %391 = vadd.xlane.f32.xlu1 %v390_v30  ;;  %v389_v35 = vmul.f32 %v735_v33, %v388_v34 }
 0x28b   : > { %648 = vmatmul.mubr.msk.bf16.vlgmr.msra.gmra.mrb[0].mxu1 %vm372_vm4, %v396_v31 }
 0x29b   : > { %449 = vperm.xlu1 %731, %v735_v33  }
 0x317   : > { %v392_v36 = vpop.xlane.xlu1 %391 }
 0x318   : > { %v393_v37 = vadd.f32 %v392_v36, %v389_v35 }
 0x31a   : > { %395 = vst.msk [vmem:[#allocation3] sm:$0xff] %vm297_vm0, %v393_v37 }
 0x31b   : > { %v450_v39 = vpop.permute.xlu1 %449 }
 0x31c   : > { %v452_v40 = vmul.f32 %v450_v39, %v446_v38 }
 0x35e   : > { %v440_v41 = vpop.f32.mrb[0].mxu1 }
 0x35f   : > { %v453_v42 = vadd.f32 %v452_v40, %v440_v41  ;;  %v649_v43 = vpop.f32.mrb[1].mxu1 }
 0x360   : > { %v443_v44 = vpop.f32.mrb[2].mxu1 }
 0x361   : > { %454 = vst.msk [vmem:[#allocation4] sm:$0xff] %vm300_vm1, %v453_v42  ;;  %v650_v45 = vpop.f32.mrb[3].mxu1 }
 0x362 PF: > { %v459_v46 = vld [vmem:[#allocation3] sm:$0xff]  ;;  %v938_v47 = vmov 0   ;;  %s632_s6 = sshll.u32 %s919_s28, 7  ;;  %s485_s23 = sshll.u32 %s291_s10, 4  ;;  %s1210_s23 = int_to_ptr.vmem [resolvable:$true] %s485_s23 }
 0x363   : > { %736 = vset.pattern.permute.xlu0 %v938_v47  ;;  %737 = vrcp.f32 %v459_v46  ;;  %s1208_s8 = scalar_lea.hbm %s1264_s4, %s632_s6  ;;  %s471_s14 = scalar_lea.sflag [#allocation9], %s1169_s7 }
 0x364   : > { %s839_s16 = scalar_lea.vmem %s1210_s23, 128  ;;  %p1287_p11 = scmp.ne.s32.totalorder %s1275_s11, 0 }
 0x365   : > { %p840_p4 = scmp.ne.s32.totalorder %s1210_s23, %s839_s16  ;;  %s939_s28 = smov [#allocation13]  }
 0x366   : > { %s843_s2 = sshll.u32 %s939_s28, 4  ;;  %s844_s2 = int_to_ptr.vmem [resolvable:$false] %s843_s2 }
 0x367   : > { %p841_p12 = pnand %p840_p4, %p1287_p11  ;;  %s845_s15 = scalar_lea.vmem %s844_s2, 256 }
 0x368   : > { %v461_v49 = vld [vmem:[#allocation4] sm:$0xff]  ;;  %p846_p2 = scmp.lt.s32.totalorder %s1210_s23, %s844_s2  ;;  %p847_p0 = scmp.lt.s32.totalorder %s845_s15, %s839_s16 }
 0x369   : > { %p842_p9 = pneg %p841_p12 }
 0x36a   : > { %p848_p5 = por %p847_p0, %p846_p2 }
 0x36c   : > { %p849_p8 = pnand %p848_p5, %p842_p9 }
 0x36d   : > { %v738_v48 = vpop.eup %737 }
 0x36e   : > { %464 = vperm.xlu0 %736, %v738_v48  }
 0x3ed   : > { %v465_v50 = vpop.permute.xlu0 %464 }
 0x3ee   : > { %v467_v51 = vmul.f32 %v465_v50, %v461_v49 }
 0x3f0   : > { %469 = vst.msk [vmem:[%s291_s10] sm:$0xff] %vm300_vm1, %v467_v51 }
 0x3f1   : > { %852 = shalt.err (!%p849_p8)
}
 0x3f2   : > { %s853_s18 = scalar_lea.hbm %s1208_s8, 128  ;;  %s857_s21 = scalar_lea.hbm %s1264_s4, 256 }
 0x3f3   : > { %p854_p10 = scmp.ne.s32.totalorder %s1208_s8, %s853_s18  ;;  %p858_p7 = scmp.lt.u32.totalorder %s1208_s8, %s1264_s4 }
 0x3f4   : > { %p859_p13 = scmp.lt.u32.totalorder %s857_s21, %s853_s18  ;;  %p861_p4 = scmp.lt.u32.totalorder %s853_s18, %s1208_s8 }
 0x3f5   : > { %p855_p6 = pnand %p854_p10, %p1287_p11 }
 0x3f6   : > { %p860_p1 = por %p859_p13, %p858_p7 }
 0x3f7   : > { %p856_p3 = pneg %p855_p6 }
 0x3f8   : > { %p862_p12 = por %p861_p4, %p860_p1 }
 0x3fa   : > { %p863_p9 = pnand %p862_p12, %p856_p3 }
 0x3fc   : > { %866 = shalt.err (!%p863_p9)
}
 0x3fd   : > { %657 = dma.vmem_to_hbm [thread:$0]  (%p1287_p11), %s1210_s23, 128, %s1208_s8, %s471_s14  }
 0x3fe PF: > { %s497_s17 = sand.u32 1, %s907_s25   ;;  %p1288_p2 = scmp.ne.s32.totalorder %s1277_s13, 0 }
 0x3ff   : > { %p1289_p0 = scmp.ge.s32.totalorder %s927_s0, 2  ;;  %s498_s24 = scalar_lea.sflag [#allocation9], %s497_s17 }
 0x401   : > { %p670_p5 = pnand %p1289_p0, %p1288_p2 }
 0x403   : > { %902 = dma.done.wait (!%p670_p5), %s498_s24, 128  }
 0x404   : > { %904 = vsyncadd (!%p670_p5), %s498_s24, 4294967168  ;;  %s27_s0 = sadd.s32 1, %s927_s0   ;;  %s1290_s11 = sld [smem:[#allocation20_spill]] }
 0x405   : > { %p24_p8 = scmp.ge.s32.totalorder %s27_s0, 4   ;;  %s1291_s28 = sld [smem:[#allocation18_spill]] }
 0x406   : > { %s1292_s29 = sld [smem:[#allocation19_spill]]  ;;  %s1293_s25 = smov %s911_s26 }
 0x407   : > { %s1294_s26 = smov %s915_s27  ;;  %26 = sbr.rel (!%p24_p8) target bundleno = 20 (0x14), region = 113 }
 0x40a   : > { %s1295_s27 = smov %s1290_s11 }
 0x40e   :  { %503 = vsyncpa [#allocation8], 1 }
 0x40f   :  { %505 = vsyncpa [#allocation8 + $0x1], 1 }
 0x410   :  { %506 = vsyncpa [#allocation11], 1 }
 0x411   :  { %508 = vsyncpa [#allocation11 + $0x1], 1 }
 0x412   :  { %509 = vsyncpa [#allocation9], 1 }
 0x413   :  { %511 = vsyncpa [#allocation9 + $0x1], 1 }

</bundles_post_ra>
